<compile_context>
chip_gen: v7x
topology: tpu7x:2x2x1
jax: 0.10.0
libtpu: 0.0.40
codegen_flags: <defaults>
</compile_context>

<pallas_src>
import jax
import jax.numpy as jnp
from jax.experimental import pallas as pl
from jax.experimental.pallas import tpu as pltpu

_LANE = 128
_SUBLANE = 8

_CompilerParams = getattr(pltpu, "CompilerParams", None)
if _CompilerParams is None:  # very old jax fallback
    _CompilerParams = getattr(pltpu, "TPUCompilerParams")


def _round_up(x: int, m: int) -> int:
    return ((x + m - 1) // m) * m


def _vmem_budget_bytes() -> int:
    """Per-generation VMEM budget: capacity minus ~16 MiB headroom."""
    try:
        info = pltpu.get_tpu_info()
        cap = int(info.vmem_capacity_bytes)
        if cap > 0:
            return max(32 * 1024 * 1024, cap - 16 * 1024 * 1024)
    except Exception:
        pass
    return 48 * 1024 * 1024  # conservative: safe even on v7x's 64 MiB per TC


def _vmem_estimate_bytes(tb, th, F, Hp, C, x_bytes, w_bytes, out_bytes):
    Fl = _round_up(F, _LANE)
    Cl = _round_up(C, _LANE)
    nbuf_w = 2 if th < Hp else 1          # resident weights are Buffered(1)
    b = 2 * tb * Fl * x_bytes             # x tiles (double-buffered)
    b += 2 * tb * Cl * out_bytes          # output tiles (double-buffered)
    b += nbuf_w * (Fl * th * w_bytes + _SUBLANE * th * 4)   # w1 (+ b1)
    b += nbuf_w * (th * Cl * w_bytes + _SUBLANE * Cl * 4)   # w2 (+ b2)
    b += tb * Cl * 4                      # f32 accumulator scratch
    b += 2 * tb * th * 4 + tb * Cl * 4    # f32 in-kernel intermediates
    return b


def _pick_tiles(B, F, Hp, C, x_bytes, w_bytes, out_bytes, block_b, fit_budget):
    """Choose (TB, TH): batch tile and hidden tile.  TH always divides Hp."""
    TB0 = _round_up(min(block_b, _round_up(B, _SUBLANE)), _SUBLANE)
    tb_floor = min(TB0, 256)

    m = Hp // _LANE
    th_cands = [_LANE * d for d in
                sorted({d for d in range(1, m + 1) if m % d == 0}, reverse=True)]

    def est(tb, th):
        return _vmem_estimate_bytes(tb, th, F, Hp, C, x_bytes, w_bytes, out_bytes)

    # Prefer keeping weights fully resident; shrink TB down to a floor first,
    # then split the hidden dim, and only then shrink TB below the floor.
    for TH in th_cands:
        TB = TB0
        while TB > tb_floor and est(TB, TH) > fit_budget:
            TB = max(tb_floor, _round_up(TB // 2, _SUBLANE))
        if est(TB, TH) <= fit_budget:
            return TB, TH
    TH = th_cands[-1]
    TB = tb_floor
    while TB > _SUBLANE and est(TB, TH) > fit_budget:
        TB = max(_SUBLANE, _round_up(TB // 2, _SUBLANE))
    return TB, TH


def _spec(shape, index_map, resident):
    """BlockSpec; single-buffer (Buffered(1)) when the block is grid-invariant."""
    if resident and hasattr(pl, "Buffered"):
        try:
            return pl.BlockSpec(shape, index_map, pipeline_mode=pl.Buffered(1))
        except TypeError:
            pass
    return pl.BlockSpec(shape, index_map)


def _mlp_kernel(x_ref, w1_ref, b1_ref, w2_ref, b2_ref, o_ref, acc_ref):
    j = pl.program_id(1)

    @pl.when(j == 0)
    def _init():
        acc_ref[...] = jnp.broadcast_to(
            b2_ref[...].astype(jnp.float32), acc_ref.shape)

    # fc1 (+ bias) + ReLU on this hidden-dim slice; f32 accumulation on the MXU.
    x = x_ref[...].astype(w1_ref.dtype)
    h = jnp.dot(x, w1_ref[...], preferred_element_type=jnp.float32)
    h = jnp.maximum(h + b1_ref[...].astype(jnp.float32), 0.0)
    # fc2 contribution of this hidden slice, accumulated in f32.
    acc_ref[...] += jnp.dot(h.astype(w2_ref.dtype), w2_ref[...],
                            preferred_element_type=jnp.float32)

    @pl.when(j == pl.num_programs(1) - 1)
    def _finalize():
        logits = acc_ref[...]
        # exact sigmoid: probabilities stay in [0, 1]; exp rides the EUP slot.
        p = 1.0 / (1.0 + jnp.exp(-logits))
        o_ref[...] = p.astype(o_ref.dtype)


def multilabel_net(x, w1, b1, w2, b2, *, block_b: int = 512,
                   cast_weights_to_bf16: bool = True,
                   out_dtype=jnp.float32):
    """Forward pass of MultiLabelNet via one pallas_call.

    x:  [B, num_features]
    w1: [num_features, hidden],  b1: [hidden] or [1, hidden]
    w2: [hidden, num_classes],   b2: [num_classes] or [1, num_classes]
    returns [B, num_classes] probabilities in [0, 1] (out_dtype, default f32).
    Weights stored as [in, out] (equivalent to PyTorch's x @ W.T + b).
    """
    B, F = x.shape
    H = w1.shape[1]
    C = w2.shape[1]

    # Biases stay f32 (cheap, and all elementwise math is f32 — v5e-safe).
    b1 = jnp.asarray(b1).reshape(1, H).astype(jnp.float32)
    b2 = jnp.asarray(b2).reshape(1, C).astype(jnp.float32)

    # bf16 weights by default: f32 matmul is a fraction of bf16 MXU throughput
    # on every generation and halves resident-weight VMEM.  Accumulation stays
    # f32.  x is cast in-kernel (no extra HBM pass over activations).
    if cast_weights_to_bf16 and w1.dtype == jnp.float32:
        w1 = w1.astype(jnp.bfloat16)
    if cast_weights_to_bf16 and w2.dtype == jnp.float32:
        w2 = w2.astype(jnp.bfloat16)

    x_bytes = jnp.dtype(x.dtype).itemsize
    w_bytes = jnp.dtype(w1.dtype).itemsize
    out_bytes = jnp.dtype(out_dtype).itemsize

    # Pad only the hidden dim (zero padding is exact for both linears).
    # Round the fc2 contraction dim to 256 when >128 (v6e/v7x MXU depth).
    Hp = _round_up(H, _LANE)
    if Hp > _LANE and Hp % 256 != 0:
        Hp = _round_up(H, 256)
    w1p = jnp.pad(w1, ((0, 0), (0, Hp - H)))
    b1p = jnp.pad(b1, ((0, 0), (0, Hp - H)))
    w2p = jnp.pad(w2, ((0, Hp - H), (0, 0)))

    budget = _vmem_budget_bytes()
    fit_budget = (budget * 17) // 20  # ~15% slack for Mosaic internal scratch

    TB, TH = _pick_tiles(B, F, Hp, C, x_bytes, w_bytes, out_bytes,
                         block_b, fit_budget)

    grid_b = pl.cdiv(B, TB)           # ragged last batch tile: OOB writes masked
    grid_h = Hp // TH
    resident = (grid_h == 1)          # weights DMA'd once -> single-buffer them

    out = pl.pallas_call(
        _mlp_kernel,
        out_shape=jax.ShapeDtypeStruct((B, C), out_dtype),
        grid=(grid_b, grid_h),
        in_specs=[
            pl.BlockSpec((TB, F), lambda i, j: (i, 0)),          # x: batch-tiled
            _spec((F, TH), lambda i, j: (0, j), resident),       # w1
            _spec((1, TH), lambda i, j: (0, j), resident),       # b1
            _spec((TH, C), lambda i, j: (j, 0), resident),       # w2
            _spec((1, C), lambda i, j: (0, 0), True),            # b2: always resident
        ],
        out_specs=pl.BlockSpec((TB, C), lambda i, j: (i, 0)),
        scratch_shapes=[pltpu.VMEM((TB, C), jnp.float32)],       # logits accumulator
        compiler_params=_CompilerParams(
            dimension_semantics=("parallel", "arbitrary"),
            vmem_limit_bytes=budget,
        ),
    )(x, w1p, b1p, w2p, b2)

    return out


def init_params(key, num_features, hidden, num_classes, dtype=jnp.float32):
    """nn.Linear default init: U(-1/sqrt(fan_in), +1/sqrt(fan_in))."""
    k1, k2, k3, k4 = jax.random.split(key, 4)
    bound1 = 1.0 / (num_features ** 0.5)
    bound2 = 1.0 / (hidden ** 0.5)
    w1 = jax.random.uniform(k1, (num_features, hidden), jnp.float32, -bound1, bound1)
    b1 = jax.random.uniform(k2, (hidden,), jnp.float32, -bound1, bound1)
    w2 = jax.random.uniform(k3, (hidden, num_classes), jnp.float32, -bound2, bound2)
    b2 = jax.random.uniform(k4, (num_classes,), jnp.float32, -bound2, bound2)
    return (w1.astype(dtype), b1.astype(dtype), w2.astype(dtype), b2.astype(dtype))


def _reference(x, w1, b1, w2, b2):
    h = jnp.maximum(x.astype(jnp.float32) @ w1.astype(jnp.float32)
                    + b1.astype(jnp.float32).reshape(1, -1), 0.0)
    logits = h @ w2.astype(jnp.float32) + b2.astype(jnp.float32).reshape(1, -1)
    return jax.nn.sigmoid(logits)


if __name__ == "__main__":
    # Small synthetic shapes consistent with the module's forward.
    batch, num_features, hidden, num_classes = 8, 16, 32, 4

    key = jax.random.PRNGKey(0)
    kx, kp = jax.random.split(key)
    x = jax.random.normal(kx, (batch, num_features), dtype=jnp.float32)
    w1, b1, w2, b2 = init_params(kp, num_features, hidden, num_classes)
    ref = _reference(x, w1, b1, w2, b2)

    # Default path: bf16 weights on the MXU, f32 accumulation / epilogue.
    out = multilabel_net(x, w1, b1, w2, b2)
    jax.block_until_ready(out)
    assert out.shape == (batch, num_classes)
    assert bool(jnp.all(jnp.isfinite(out)))
    assert bool(jnp.all((out >= 0.0) & (out <= 1.0)))
    assert jnp.allclose(out, ref, atol=3e-2, rtol=3e-2)

    # Full-f32 path (tighter tolerance).
    out_f32 = multilabel_net(x, w1, b1, w2, b2, cast_weights_to_bf16=False)
    jax.block_until_ready(out_f32)
    assert jnp.allclose(out_f32, ref, atol=2e-3, rtol=2e-3)

    # Ragged batch (B not a multiple of the tile): exercises the cdiv grid /
    # masked last-tile path with no wrapper-side padding of x or the output.
    x2 = jax.random.normal(kx, (5, num_features), dtype=jnp.float32)
    out2 = multilabel_net(x2, w1, b1, w2, b2, cast_weights_to_bf16=False, block_b=8)
    jax.block_until_ready(out2)
    assert out2.shape == (5, num_classes)
    assert jnp.allclose(out2, _reference(x2, w1, b1, w2, b2), atol=2e-3, rtol=2e-3)

    print("KERNEL_OK")
</pallas_src>

<mosaic_0001>
module attributes {stable_mosaic.version = 11 : i64} {
  func.func @_mlp_kernel(%arg0: i32, %arg1: i32, %arg2: memref<8x16xf32, #tpu.memory_space<vmem>>, %arg3: memref<16x128xbf16, #tpu.memory_space<vmem>>, %arg4: memref<1x128xf32, #tpu.memory_space<vmem>>, %arg5: memref<128x4xbf16, #tpu.memory_space<vmem>>, %arg6: memref<1x4xf32, #tpu.memory_space<vmem>>, %arg7: memref<8x4xf32, #tpu.memory_space<vmem>>, %arg8: memref<8x4xf32, #tpu.memory_space<vmem>>) attributes {dimension_semantics = [#tpu.dimension_semantics<parallel>, #tpu.dimension_semantics<arbitrary>], iteration_bounds = array<i64: 1, 1>, scalar_prefetch = 0 : i64, scratch_operands = 1 : i64, tpu.core_type = #tpu.core_type<tc>, window_params = [{transform_indices = @transform_0, window_bounds = array<i64: 8, 16>}, {pipeline_mode = #tpu.pipeline_mode<synchronous>, transform_indices = @transform_1, window_bounds = array<i64: 16, 128>}, {pipeline_mode = #tpu.pipeline_mode<synchronous>, transform_indices = @transform_2, window_bounds = array<i64: 1, 128>}, {pipeline_mode = #tpu.pipeline_mode<synchronous>, transform_indices = @transform_3, window_bounds = array<i64: 128, 4>}, {pipeline_mode = #tpu.pipeline_mode<synchronous>, transform_indices = @transform_4, window_bounds = array<i64: 1, 4>}, {transform_indices = @transform_5, window_bounds = array<i64: 8, 4>}]} {
    %c0_i32 = arith.constant 0 : i32
    %0 = arith.cmpi eq, %arg1, %c0_i32 : i32
    %1 = arith.extui %0 : i1 to i32
    %c0_i32_0 = arith.constant 0 : i32
    %2 = arith.cmpi ne, %1, %c0_i32_0 : i32
    scf.if %2 {
      %c0_16 = arith.constant 0 : index
      %c0_17 = arith.constant 0 : index
      %21 = vector.load %arg6[%c0_16, %c0_17] : memref<1x4xf32, #tpu.memory_space<vmem>>, vector<1x4xf32>
      %22 = vector.shape_cast %21 : vector<1x4xf32> to vector<1x4xf32>
      %23 = vector.broadcast %22 : vector<1x4xf32> to vector<8x4xf32>
      %c0_18 = arith.constant 0 : index
      %c0_19 = arith.constant 0 : index
      %24 = vector.load %arg8[%c0_18, %c0_19] : memref<8x4xf32, #tpu.memory_space<vmem>>, vector<8x4xf32>
      tpu.vector_store %arg8[%c0_18, %c0_19], %23 {strides = array<i32>} : memref<8x4xf32, #tpu.memory_space<vmem>>, vector<8x4xf32>,
    } else {
    }
    %c0 = arith.constant 0 : index
    %c0_1 = arith.constant 0 : index
    %3 = vector.load %arg2[%c0, %c0_1] : memref<8x16xf32, #tpu.memory_space<vmem>>, vector<8x16xf32>
    %4 = arith.truncf %3 : vector<8x16xf32> to vector<8x16xbf16>
    %c0_2 = arith.constant 0 : index
    %c0_3 = arith.constant 0 : index
    %5 = vector.load %arg3[%c0_2, %c0_3] : memref<16x128xbf16, #tpu.memory_space<vmem>>, vector<16x128xbf16>
    %cst = arith.constant dense<0.000000e+00> : vector<8x128xf32>
    %6 = tpu.matmul %4, %5, %cst {dimension_numbers = #tpu.dot_dimension_numbers<[1], [0], [0], [1], [0, 0, 1, 1], [], []>} : vector<8x16xbf16>, vector<16x128xbf16>, vector<8x128xf32> -> vector<8x128xf32>
    %c0_4 = arith.constant 0 : index
    %c0_5 = arith.constant 0 : index
    %7 = vector.load %arg4[%c0_4, %c0_5] : memref<1x128xf32, #tpu.memory_space<vmem>>, vector<1x128xf32>
    %8 = vector.broadcast %7 : vector<1x128xf32> to vector<8x128xf32>
    %9 = arith.addf %6, %8 : vector<8x128xf32>
    %cst_6 = arith.constant 0.000000e+00 : f32
    %10 = vector.broadcast %cst_6 : f32 to vector<8x128xf32>
    %11 = arith.maximumf %9, %10 : vector<8x128xf32>
    %c0_7 = arith.constant 0 : index
    %c0_8 = arith.constant 0 : index
    %12 = vector.load %arg8[%c0_7, %c0_8] : memref<8x4xf32, #tpu.memory_space<vmem>>, vector<8x4xf32>
    %13 = arith.truncf %11 : vector<8x128xf32> to vector<8x128xbf16>
    %c0_9 = arith.constant 0 : index
    %c0_10 = arith.constant 0 : index
    %14 = vector.load %arg5[%c0_9, %c0_10] : memref<128x4xbf16, #tpu.memory_space<vmem>>, vector<128x4xbf16>
    %cst_11 = arith.constant dense<0.000000e+00> : vector<8x4xf32>
    %15 = tpu.matmul %13, %14, %cst_11 {dimension_numbers = #tpu.dot_dimension_numbers<[1], [0], [0], [1], [0, 0, 1, 1], [], []>} : vector<8x128xbf16>, vector<128x4xbf16>, vector<8x4xf32> -> vector<8x4xf32>
    %16 = arith.addf %12, %15 : vector<8x4xf32>
    %c0_12 = arith.constant 0 : index
    %c0_13 = arith.constant 0 : index
    %17 = vector.load %arg8[%c0_12, %c0_13] : memref<8x4xf32, #tpu.memory_space<vmem>>, vector<8x4xf32>
    tpu.vector_store %arg8[%c0_12, %c0_13], %16 {strides = array<i32>} : memref<8x4xf32, #tpu.memory_space<vmem>>, vector<8x4xf32>,
    %c0_i32_14 = arith.constant 0 : i32
    %18 = arith.cmpi eq, %arg1, %c0_i32_14 : i32
    %19 = arith.extui %18 : i1 to i32
    %c0_i32_15 = arith.constant 0 : i32
    %20 = arith.cmpi ne, %19, %c0_i32_15 : i32
    scf.if %20 {
      %c0_16 = arith.constant 0 : index
      %c0_17 = arith.constant 0 : index
      %21 = vector.load %arg8[%c0_16, %c0_17] : memref<8x4xf32, #tpu.memory_space<vmem>>, vector<8x4xf32>
      %cst_18 = arith.constant 0.000000e+00 : f32
      %22 = vector.broadcast %cst_18 : f32 to vector<8x4xf32>
      %23 = arith.subf %22, %21 : vector<8x4xf32>
      %24 = math.exp %23 : vector<8x4xf32>
      %cst_19 = arith.constant 1.000000e+00 : f32
      %25 = vector.broadcast %cst_19 : f32 to vector<8x4xf32>
      %26 = arith.addf %25, %24 : vector<8x4xf32>
      %cst_20 = arith.constant 1.000000e+00 : f32
      %27 = vector.broadcast %cst_20 : f32 to vector<8x4xf32>
      %28 = arith.divf %27, %26 : vector<8x4xf32>
      %c0_21 = arith.constant 0 : index
      %c0_22 = arith.constant 0 : index
      %29 = vector.load %arg7[%c0_21, %c0_22] : memref<8x4xf32, #tpu.memory_space<vmem>>, vector<8x4xf32>
      tpu.vector_store %arg7[%c0_21, %c0_22], %28 {strides = array<i32>} : memref<8x4xf32, #tpu.memory_space<vmem>>, vector<8x4xf32>,
    } else {
    }
    return
  }
  func.func @transform_0(%arg0: i32, %arg1: i32) -> (i32, i32) {
    %c0_i32 = arith.constant 0 : i32
    %c0_i32_0 = arith.constant 0 : i32
    return %arg0, %c0_i32 : i32, i32
  }
  func.func @transform_1(%arg0: i32, %arg1: i32) -> (i32, i32) {
    %c0_i32 = arith.constant 0 : i32
    %c0_i32_0 = arith.constant 0 : i32
    return %c0_i32, %arg1 : i32, i32
  }
  func.func @transform_2(%arg0: i32, %arg1: i32) -> (i32, i32) {
    %c0_i32 = arith.constant 0 : i32
    %c0_i32_0 = arith.constant 0 : i32
    return %c0_i32, %arg1 : i32, i32
  }
  func.func @transform_3(%arg0: i32, %arg1: i32) -> (i32, i32) {
    %c0_i32 = arith.constant 0 : i32
    %c0_i32_0 = arith.constant 0 : i32
    return %arg1, %c0_i32 : i32, i32
  }
  func.func @transform_4(%arg0: i32, %arg1: i32) -> (i32, i32) {
    %c0_i32 = arith.constant 0 : i32
    %c0_i32_0 = arith.constant 0 : i32
    %c0_i32_1 = arith.constant 0 : i32
    return %c0_i32, %c0_i32_0 : i32, i32
  }
  func.func @transform_5(%arg0: i32, %arg1: i32) -> (i32, i32) {
    %c0_i32 = arith.constant 0 : i32
    %c0_i32_0 = arith.constant 0 : i32
    return %arg0, %c0_i32 : i32, i32
  }
}

</mosaic_0001>

<bundles_post_ra>
// kernel: tpu_custom_call.1
= control target key start
LH: loop header
LB: loop body
LE: loop exit
PB: predicated region body
PF: predicated region fallthrough
CT: control target
= control target key end

     0   :  { %v284_v0 = vmov 0.0   ;;  %vm285_vm0 = vmmov 0   ;;  %vm51_vm1 = vcmask 130048   ;;  %vm32_vm2 = vcmask 31744   ;;  %s358_s1 = inlined_call_operand.vmem [shape: bf16[16,128], index: 1, kind: input, shape index: {}]   ;;  %s359_s0 = inlined_call_operand.vmem [shape: f32[8,16], index: 0, kind: input, shape index: {}]   ;;  %s360_s3 = inlined_call_operand.vmem [shape: bf16[128,4], index: 3, kind: input, shape index: {}]   ;;  %s361_s4 = inlined_call_operand.vmem [shape: f32[1,4], index: 4, kind: input, shape index: {}]   ;;  %s362_s2 = inlined_call_operand.vmem [shape: f32[1,128], index: 2, kind: input, shape index: {}]   ;;  %s363_s5 = inlined_call_operand.vmem [shape: f32[8,4], index: 5, kind: output, shape index: {}]  }
   0x1   :  { %243 = vmatprep.subr.bf16.mxu0 %v284_v0  ;;  %v271_v1 = vld [vmem:[%s358_s1] sm:$0xff]   ;;  %245 = vmatprep.mubr.msk.bf16.mxu0 %vm285_vm0, %v284_v0  ;;  %v273_v5 = vld [vmem:[%s360_s3 + $0x8] sm:$0xff]   ;;  %v274_v6 = vld [vmem:[%s360_s3 + $0x10] sm:$0xff]  }
   0x2   :  { %v34_v2 = vld [vmem:[%s359_s0] sm:$0xff]  ;;  %249 = vmatprep.subr.bf16.mxu1 %v284_v0  ;;  %265 = vmatprep.mubr.msk.bf16.mxu1 %vm285_vm0, %v284_v0  ;;  %v275_v7 = vld [vmem:[%s360_s3 + $0x18] sm:$0xff]   ;;  %v277_v9 = vld [vmem:[%s360_s3 + $0x28] sm:$0xff]  }
   0x3   :  { %244 = vmatpush3.bf16.msra.mxu0 %v271_v1  ;;  %v35_v3 = vpack.c.bf16 %v34_v2, %v34_v2  ;;  %v272_v4 = vld [vmem:[%s360_s3] sm:$0xff]   ;;  %v278_v10 = vld [vmem:[%s360_s3 + $0x30] sm:$0xff]   ;;  %v279_v11 = vld [vmem:[%s360_s3 + $0x38] sm:$0xff]  }
   0x4   :  { %250 = vmatpush3.bf16.msra.mxu1 %v272_v4  ;;  %v276_v8 = vld [vmem:[%s360_s3 + $0x20] sm:$0xff]  }
   0x5   :  { %251 = vmatprep.subr.bf16.mxu1 %v284_v0  ;;  %v220_v12 = vld [vmem:[%s361_s4] ss:$0 sm:$0xff] }
   0x6   :  { %246 = vmatmul.mubr.msk.bf16.vlgmr.msra.gmra.mrb[0].mxu0 %vm51_vm1, %v35_v3  ;;  %33 = vst.msk [vmem:[#allocation2] sm:$0xff] %vm32_vm2, %v220_v12  ;;  %v221_v13 = vld [vmem:[%s362_s2] ss:$0 sm:$0xff] }
   0x8   :  { %252 = vmatpush3.bf16.msra.mxu1 %v273_v5 }
   0x9   :  { %253 = vmatprep.subr.bf16.mxu1 %v284_v0 }
   0xc   :  { %254 = vmatpush3.bf16.msra.mxu1 %v274_v6 }
   0xd   :  { %255 = vmatprep.subr.bf16.mxu1 %v284_v0  ;;  %v96_v21 = vld [vmem:[#allocation2] sm:$0xff] }
  0x10   :  { %256 = vmatpush3.bf16.msra.mxu1 %v275_v7 }
  0x11   :  { %257 = vmatprep.subr.bf16.mxu1 %v284_v0 }
  0x14   :  { %258 = vmatpush3.bf16.msra.mxu1 %v276_v8 }
  0x15   :  { %259 = vmatprep.subr.bf16.mxu1 %v284_v0 }
  0x18   :  { %260 = vmatpush3.bf16.msra.mxu1 %v277_v9 }
  0x19   :  { %261 = vmatprep.subr.bf16.mxu1 %v284_v0 }
  0x1c   :  { %262 = vmatpush3.bf16.msra.mxu1 %v278_v10 }
  0x1d   :  { %263 = vmatprep.subr.bf16.mxu1 %v284_v0 }
  0x20   :  { %264 = vmatpush3.bf16.msra.mxu1 %v279_v11 }
  0xd9   :  { %v89_v14 = vpop.f32.mrb[0].mxu0 }
  0xda   :  { %v90_v15 = vadd.f32 %v221_v13, %v89_v14  ;;  %v247_v16 = vpop.f32.mrb[1].mxu0 }
  0xdb   :  { %v92_v17 = vpop.f32.mrb[2].mxu0 }
  0xdc   :  { %v95_v18 = vmax.f32 %v90_v15, 0.0  ;;  %v248_v19 = vpop.f32.mrb[3].mxu0 }
  0xde   :  { %v97_v20 = vpack.c.bf16 %v95_v18, %v95_v18 }
  0xe0   :  { %266 = vmatmul.mubr.bf16.vlgmr.msra.gmra.mrb[0].mxu1 %v97_v20 }
 0x1b3   :  { %v196_v22 = vpop.f32.mrb[0].mxu1 }
 0x1b4   :  { %v202_v23 = vadd.f32 %v196_v22, %v96_v21  ;;  %v267_v24 = vpop.f32.mrb[1].mxu1 }
 0x1b5   :  { %v199_v25 = vpop.f32.mrb[2].mxu1 }
 0x1b6   :  { %204 = vst.msk [vmem:[#allocation2] sm:$0xff] %vm32_vm2, %v202_v23  ;;  %v268_v26 = vpop.f32.mrb[3].mxu1 }
 0x1bd   :  { %v208_v27 = vld [vmem:[#allocation2] sm:$0xff] }
 0x1be   :  { %v209_v28 = vsub.f32 0.0, %v208_v27 }
 0x1c0   :  { %v210_v29 = vmul.f32 1.442695, %v209_v28 }
 0x1c2   :  { %280 = vpow2.f32 %v210_v29 }
 0x1cc   :  { %v281_v30 = vpop.eup %280 }
 0x1cd   :  { %v212_v31 = vadd.f32 1.0, %v281_v30 }
 0x1cf   :  { %282 = vrcp.f32 %v212_v31 }
 0x1d9   :  { %v283_v32 = vpop.eup %282 }
 0x1da   :  { %215 = vst.msk [vmem:[%s363_s5] sm:$0xff] %vm32_vm2, %v283_v32 }

</bundles_post_ra>
